<compile_context>
chip_gen: v7x
topology: tpu7x:2x2x1
jax: 0.10.0
libtpu: 0.0.40
codegen_flags: <defaults>
</compile_context>

<pallas_src>
import functools
import math

import jax
import jax.numpy as jnp
from jax.experimental import pallas as pl
from jax.experimental.pallas import tpu as pltpu


def _round_up(x, m):
    return (x + m - 1) // m * m


def _sublane_pack(dtype):
    # Native second-minor packing: 8 rows for 32-bit, 16 for bf16, 32 for i8/fp8.
    return max(8, 32 // jnp.dtype(dtype).itemsize)


def _vmem_capacity_bytes():
    try:
        return int(pltpu.get_tpu_info().vmem_capacity_bytes)
    except Exception:
        return 64 * 2**20  # conservative default (v7x per-TensorCore)


def _pick_th(Hp, target=512):
    """Largest multiple of 128 that divides Hp and is <= target."""
    nh = Hp // 128
    t = min(nh, max(1, target // 128))
    while nh % t:
        t -= 1
    return t * 128


def ffn_kernel(x_ref, w1_ref, b1_ref, w2_ref, lnb_ref, o_ref, acc_ref, *,
               e_true, eps):
    k = pl.program_id(1)

    @pl.when(k == 0)
    def _init():
        acc_ref[...] = jnp.zeros_like(acc_ref)

    x_in = x_ref[...]                                        # (tm, Ep), x dtype

    # linear1 tile + bias + ReLU.  Cast x to the weight dtype so bf16 weights
    # feed the MXU at native rate; accumulate in f32.
    h = jnp.dot(x_in.astype(w1_ref.dtype), w1_ref[...],
                preferred_element_type=jnp.float32)          # (tm, th) f32
    h = jnp.maximum(h + b1_ref[...], 0.0)

    # linear2 partial contraction over this H tile -> f32 accumulator.
    acc_ref[...] += jnp.dot(h.astype(w2_ref.dtype), w2_ref[...],
                            preferred_element_type=jnp.float32)

    @pl.when(k == pl.num_programs(1) - 1)
    def _finalize():
        lnv = lnb_ref[...]                                   # (3, Ep) f32
        y = acc_ref[...] + lnv[0:1, :]                       # + b2
        r = x_in.astype(jnp.float32) + y                     # residual, f32

        # LayerNorm over the *true* embedding width E. Padded lanes of r are
        # exactly 0 (x, W2 columns and b2 are zero-padded), so only the
        # centered value needs masking before the variance / affine step.
        inv_e = 1.0 / e_true
        mean = jnp.sum(r, axis=-1, keepdims=True) * inv_e
        cent = r - mean
        if r.shape[-1] != e_true:
            col = jax.lax.broadcasted_iota(jnp.int32, r.shape, 1)
            cent = jnp.where(col < e_true, cent, 0.0)
        var = jnp.sum(cent * cent, axis=-1, keepdims=True) * inv_e
        norm = cent * jax.lax.rsqrt(var + eps)               # rsqrt on (tm,1) -> EUP
        o_ref[...] = (norm * lnv[1:2, :] + lnv[2:3, :]).astype(o_ref.dtype)


def prepare_ffn_params(w1, b1, w2, b2, gamma, beta, *, matmul_dtype=None):
    """Pad / transpose / cast FeedforwardLayer parameters ONCE (at model init).

    w1: (H, E) = linear1.weight, w2: (E, H) = linear2.weight (torch layout).
    matmul_dtype=jnp.bfloat16 stores the weights bf16 for native MXU rate
    (post-matmul math in the kernel stays f32).
    """
    H, E = w1.shape
    Ep, Hp = _round_up(E, 128), _round_up(H, 128)
    wdt = w1.dtype if matmul_dtype is None else matmul_dtype
    f32 = jnp.float32

    w1p = jnp.zeros((Ep, Hp), wdt).at[:E, :H].set(w1.T.astype(wdt))
    w2p = jnp.zeros((Hp, Ep), wdt).at[:H, :E].set(w2.T.astype(wdt))
    b1p = jnp.zeros((1, Hp), f32).at[0, :H].set(b1.astype(f32))
    lnb = (jnp.zeros((3, Ep), f32)
           .at[0, :E].set(b2.astype(f32))
           .at[1, :E].set(gamma.astype(f32))
           .at[2, :E].set(beta.astype(f32)))
    return {"w1": w1p, "b1": b1p, "w2": w2p, "lnb": lnb, "e": E, "h": H}


def feedforward_layer(x, params, *, tm=None, th=None, eps=1e-5):
    """Fused linear1 -> ReLU -> linear2 -> residual -> LayerNorm.

    x: (..., E).  params: output of prepare_ffn_params.  Returns x.shape in
    x.dtype.  dropout=0.0 in the reference module -> identity (omitted).
    """
    orig_shape = x.shape
    E = orig_shape[-1]
    assert E == params["e"], "embedding dim mismatch with prepared params"
    x2d = x.reshape(-1, E)
    N = x2d.shape[0]

    w1p, b1p, w2p, lnbp = params["w1"], params["b1"], params["w2"], params["lnb"]
    Ep, Hp = w1p.shape

    vmem_cap = _vmem_capacity_bytes()
    if tm is None:
        # v7x (64 MiB VMEM/TC) -> 256-row tiles; v5e/v6e (128 MiB) -> 512.
        tm = 256 if vmem_cap <= 64 * 2**20 else 512
    if th is None:
        th = _pick_th(Hp)

    # Row tile aligned to the dtype's sublane pack, never larger than needed,
    # and split so the "parallel" row axis has >= 2 steps (v7x megacore).
    pack = _sublane_pack(x.dtype)
    tm_eff = max(pack, min(_round_up(tm, pack), _round_up(N, pack)))
    Np = _round_up(N, tm_eff)
    while Np // tm_eff < 2 and tm_eff > pack:
        tm_eff = max(pack, _round_up(tm_eff // 2, pack))
        Np = _round_up(N, tm_eff)

    # Only pad / slice the activations when actually required (skips two full
    # HBM round-trips of x / out in the aligned common case).
    needs_pad = (Np != N) or (Ep != E)
    xp = (jnp.zeros((Np, Ep), x.dtype).at[:N, :E].set(x2d)
          if needs_pad else x2d)

    # VMEM budget from the actual tiles (double-buffered streams + scratch),
    # capped below the chip's physical per-core VMEM.
    x_isz = jnp.dtype(x.dtype).itemsize
    w_isz = jnp.dtype(w1p.dtype).itemsize
    est = (2 * tm_eff * Ep * x_isz               # x tiles (double buffered)
           + 2 * tm_eff * Ep * x_isz             # out tiles
           + 2 * (Ep * th + th * Ep) * w_isz     # W1 / W2 tiles
           + 2 * 8 * th * 4 + 2 * 8 * Ep * 4     # b1 tiles, b2/gamma/beta pack
           + tm_eff * Ep * 4                     # f32 accumulator scratch
           + 2 * tm_eff * th * 4)                # h intermediate + headroom
    vmem_limit = int(min(vmem_cap - 4 * 2**20, max(32 * 2**20, 2 * est)))

    out = pl.pallas_call(
        functools.partial(ffn_kernel, e_true=E, eps=eps),
        out_shape=jax.ShapeDtypeStruct((Np, Ep), x.dtype),
        grid_spec=pltpu.PrefetchScalarGridSpec(
            num_scalar_prefetch=0,
            grid=(Np // tm_eff, Hp // th),                  # rows x H-reduction
            in_specs=[
                pl.BlockSpec((tm_eff, Ep), lambda i, k: (i, 0)),  # x rows
                pl.BlockSpec((Ep, th), lambda i, k: (0, k)),      # W1^T tile
                pl.BlockSpec((1, th), lambda i, k: (0, k)),       # b1 tile
                pl.BlockSpec((th, Ep), lambda i, k: (k, 0)),      # W2^T tile
                pl.BlockSpec((3, Ep), lambda i, k: (0, 0)),       # b2/gamma/beta
            ],
            out_specs=pl.BlockSpec((tm_eff, Ep), lambda i, k: (i, 0)),
            scratch_shapes=[pltpu.VMEM((tm_eff, Ep), jnp.float32)],
        ),
        compiler_params=pltpu.CompilerParams(
            dimension_semantics=("parallel", "arbitrary"),  # rows shard on v7x TCs
            vmem_limit_bytes=vmem_limit,
        ),
    )(xp, w1p, b1p, w2p, lnbp)

    if needs_pad:
        out = out[:N, :E]
    return out.reshape(orig_shape)


if __name__ == "__main__":
    # Small shapes consistent with the module: batch=2, seq=8, E=32, H=64.
    B, S, E, H = 2, 8, 32, 64
    key = jax.random.PRNGKey(0)
    kx, k1, kb1, k2, kb2 = jax.random.split(key, 5)

    x = jax.random.normal(kx, (B, S, E), jnp.float32)

    def xavier_uniform(k, shape):
        fan_out, fan_in = shape
        bound = math.sqrt(6.0 / (fan_in + fan_out))
        return jax.random.uniform(k, shape, jnp.float32, -bound, bound)

    # Deterministic parameter init mirroring the torch module's __init__.
    w1 = xavier_uniform(k1, (H, E))                               # linear1.weight
    b1 = jax.random.uniform(kb1, (H,), jnp.float32,
                            -1.0 / math.sqrt(E), 1.0 / math.sqrt(E))
    w2 = xavier_uniform(k2, (E, H))                               # linear2.weight
    b2 = jax.random.uniform(kb2, (E,), jnp.float32,
                            -1.0 / math.sqrt(H), 1.0 / math.sqrt(H))
    gamma = jnp.ones((E,), jnp.float32)                           # norm.weight
    beta = jnp.zeros((E,), jnp.float32)                           # norm.bias

    # Pure-JAX reference.
    h_ref = jnp.maximum(x @ w1.T + b1, 0.0)
    y_ref = h_ref @ w2.T + b2
    r_ref = x + y_ref
    mu = r_ref.mean(-1, keepdims=True)
    var = ((r_ref - mu) ** 2).mean(-1, keepdims=True)
    ref = (r_ref - mu) / jnp.sqrt(var + 1e-5) * gamma + beta

    # f32 path (matches the torch f32 module closely).
    params_f32 = prepare_ffn_params(w1, b1, w2, b2, gamma, beta)
    out = feedforward_layer(x, params_f32)
    jax.block_until_ready(out)
    assert out.shape == x.shape
    assert jnp.allclose(out, ref, atol=2e-5, rtol=2e-5), "f32 mismatch vs reference"

    # bf16-MXU path: weights cast once at prep; post-matmul math stays f32.
    params_bf16 = prepare_ffn_params(w1, b1, w2, b2, gamma, beta,
                                     matmul_dtype=jnp.bfloat16)
    out_bf16 = feedforward_layer(x, params_bf16)
    jax.block_until_ready(out_bf16)
    assert jnp.allclose(out_bf16, ref, atol=1e-1, rtol=1e-1), \
        "bf16 drift larger than expected"

    print("KERNEL_OK")
</pallas_src>

<mosaic_0001>
module attributes {stable_mosaic.version = 11 : i64} {
  func.func @ffn_kernel(%arg0: i32, %arg1: i32, %arg2: memref<8x128xf32, #tpu.memory_space<vmem>>, %arg3: memref<128x128xf32, #tpu.memory_space<vmem>>, %arg4: memref<1x128xf32, #tpu.memory_space<vmem>>, %arg5: memref<128x128xf32, #tpu.memory_space<vmem>>, %arg6: memref<3x128xf32, #tpu.memory_space<vmem>>, %arg7: memref<8x128xf32, #tpu.memory_space<vmem>>, %arg8: memref<8x128xf32, #tpu.memory_space<vmem>>) attributes {dimension_semantics = [#tpu.dimension_semantics<parallel>, #tpu.dimension_semantics<arbitrary>], iteration_bounds = array<i64: 2, 1>, scalar_prefetch = 0 : i64, scratch_operands = 1 : i64, tpu.core_type = #tpu.core_type<tc>, window_params = [{transform_indices = @transform_0, window_bounds = array<i64: 8, 128>}, {transform_indices = @transform_1, window_bounds = array<i64: 128, 128>}, {transform_indices = @transform_2, window_bounds = array<i64: 1, 128>}, {transform_indices = @transform_3, window_bounds = array<i64: 128, 128>}, {pipeline_mode = #tpu.pipeline_mode<synchronous>, transform_indices = @transform_4, window_bounds = array<i64: 3, 128>}, {transform_indices = @transform_5, window_bounds = array<i64: 8, 128>}]} {
    %c0_i32 = arith.constant 0 : i32
    %0 = arith.cmpi eq, %arg1, %c0_i32 : i32
    %1 = arith.extui %0 : i1 to i32
    %c0_i32_0 = arith.constant 0 : i32
    %2 = arith.cmpi ne, %1, %c0_i32_0 : i32
    scf.if %2 {
      %cst_16 = arith.constant 0.000000e+00 : f32
      %19 = vector.broadcast %cst_16 : f32 to vector<8x128xf32>
      %c0_17 = arith.constant 0 : index
      %c0_18 = arith.constant 0 : index
      %20 = vector.load %arg8[%c0_17, %c0_18] : memref<8x128xf32, #tpu.memory_space<vmem>>, vector<8x128xf32>
      tpu.vector_store %arg8[%c0_17, %c0_18], %19 {strides = array<i32>} : memref<8x128xf32, #tpu.memory_space<vmem>>, vector<8x128xf32>,
    } else {
    }
    %c0 = arith.constant 0 : index
    %c0_1 = arith.constant 0 : index
    %3 = vector.load %arg2[%c0, %c0_1] : memref<8x128xf32, #tpu.memory_space<vmem>>, vector<8x128xf32>
    %c0_2 = arith.constant 0 : index
    %c0_3 = arith.constant 0 : index
    %4 = vector.load %arg3[%c0_2, %c0_3] : memref<128x128xf32, #tpu.memory_space<vmem>>, vector<128x128xf32>
    %cst = arith.constant dense<0.000000e+00> : vector<8x128xf32>
    %5 = tpu.matmul %3, %4, %cst {dimension_numbers = #tpu.dot_dimension_numbers<[1], [0], [0], [1], [0, 0, 1, 1], [], []>} : vector<8x128xf32>, vector<128x128xf32>, vector<8x128xf32> -> vector<8x128xf32>
    %c0_4 = arith.constant 0 : index
    %c0_5 = arith.constant 0 : index
    %6 = vector.load %arg4[%c0_4, %c0_5] : memref<1x128xf32, #tpu.memory_space<vmem>>, vector<1x128xf32>
    %7 = vector.broadcast %6 : vector<1x128xf32> to vector<8x128xf32>
    %8 = arith.addf %5, %7 : vector<8x128xf32>
    %cst_6 = arith.constant 0.000000e+00 : f32
    %9 = vector.broadcast %cst_6 : f32 to vector<8x128xf32>
    %10 = arith.maximumf %8, %9 : vector<8x128xf32>
    %c0_7 = arith.constant 0 : index
    %c0_8 = arith.constant 0 : index
    %11 = vector.load %arg8[%c0_7, %c0_8] : memref<8x128xf32, #tpu.memory_space<vmem>>, vector<8x128xf32>
    %c0_9 = arith.constant 0 : index
    %c0_10 = arith.constant 0 : index
    %12 = vector.load %arg5[%c0_9, %c0_10] : memref<128x128xf32, #tpu.memory_space<vmem>>, vector<128x128xf32>
    %cst_11 = arith.constant dense<0.000000e+00> : vector<8x128xf32>
    %13 = tpu.matmul %10, %12, %cst_11 {dimension_numbers = #tpu.dot_dimension_numbers<[1], [0], [0], [1], [0, 0, 1, 1], [], []>} : vector<8x128xf32>, vector<128x128xf32>, vector<8x128xf32> -> vector<8x128xf32>
    %14 = arith.addf %11, %13 : vector<8x128xf32>
    %c0_12 = arith.constant 0 : index
    %c0_13 = arith.constant 0 : index
    %15 = vector.load %arg8[%c0_12, %c0_13] : memref<8x128xf32, #tpu.memory_space<vmem>>, vector<8x128xf32>
    tpu.vector_store %arg8[%c0_12, %c0_13], %14 {strides = array<i32>} : memref<8x128xf32, #tpu.memory_space<vmem>>, vector<8x128xf32>,
    %c0_i32_14 = arith.constant 0 : i32
    %16 = arith.cmpi eq, %arg1, %c0_i32_14 : i32
    %17 = arith.extui %16 : i1 to i32
    %c0_i32_15 = arith.constant 0 : i32
    %18 = arith.cmpi ne, %17, %c0_i32_15 : i32
    scf.if %18 {
      %c0_16 = arith.constant 0 : index
      %c0_17 = arith.constant 0 : index
      %19 = vector.load %arg6[%c0_16, %c0_17] : memref<3x128xf32, #tpu.memory_space<vmem>>, vector<3x128xf32>
      %c0_18 = arith.constant 0 : index
      %c0_19 = arith.constant 0 : index
      %20 = vector.load %arg8[%c0_18, %c0_19] : memref<8x128xf32, #tpu.memory_space<vmem>>, vector<8x128xf32>
      %21 = vector.extract_strided_slice %19 {offsets = [0, 0], sizes = [1, 128], strides = [1, 1]} : vector<3x128xf32> to vector<1x128xf32>
      %22 = vector.broadcast %21 : vector<1x128xf32> to vector<8x128xf32>
      %23 = arith.addf %20, %22 : vector<8x128xf32>
      %24 = arith.addf %3, %23 : vector<8x128xf32>
      %cst_20 = arith.constant dense<0.000000e+00> : vector<8xf32>
      %25 = vector.multi_reduction <add>, %24, %cst_20 [1] : vector<8x128xf32> to vector<8xf32>
      %26 = vector.shape_cast %25 : vector<8xf32> to vector<8x1xf32>
      %cst_21 = arith.constant 3.125000e-02 : f32
      %27 = vector.broadcast %cst_21 : f32 to vector<8x1xf32>
      %28 = arith.mulf %26, %27 : vector<8x1xf32>
      %29 = vector.broadcast %28 : vector<8x1xf32> to vector<8x128xf32>
      %30 = arith.subf %24, %29 : vector<8x128xf32>
      %31 = tpu.iota {dimensions = array<i32: 1>} : vector<8x128xi32>
      %c32_i32 = arith.constant 32 : i32
      %32 = vector.broadcast %c32_i32 : i32 to vector<8x128xi32>
      %33 = arith.cmpi slt, %31, %32 : vector<8x128xi32>
      %cst_22 = arith.constant 0.000000e+00 : f32
      %34 = vector.broadcast %cst_22 : f32 to vector<8x128xf32>
      %35 = arith.select %33, %30, %34 : vector<8x128xi1>, vector<8x128xf32>
      %36 = arith.mulf %35, %35 : vector<8x128xf32>
      %cst_23 = arith.constant dense<0.000000e+00> : vector<8xf32>
      %37 = vector.multi_reduction <add>, %36, %cst_23 [1] : vector<8x128xf32> to vector<8xf32>
      %38 = vector.shape_cast %37 : vector<8xf32> to vector<8x1xf32>
      %cst_24 = arith.constant 3.125000e-02 : f32
      %39 = vector.broadcast %cst_24 : f32 to vector<8x1xf32>
      %40 = arith.mulf %38, %39 : vector<8x1xf32>
      %cst_25 = arith.constant 9.99999974E-6 : f32
      %41 = vector.broadcast %cst_25 : f32 to vector<8x1xf32>
      %42 = arith.addf %40, %41 : vector<8x1xf32>
      %43 = math.rsqrt %42 : vector<8x1xf32>
      %44 = vector.broadcast %43 : vector<8x1xf32> to vector<8x128xf32>
      %45 = arith.mulf %35, %44 : vector<8x128xf32>
      %46 = vector.extract_strided_slice %19 {offsets = [1, 0], sizes = [1, 128], strides = [1, 1]} : vector<3x128xf32> to vector<1x128xf32>
      %47 = vector.broadcast %46 : vector<1x128xf32> to vector<8x128xf32>
      %48 = arith.mulf %45, %47 : vector<8x128xf32>
      %49 = vector.extract_strided_slice %19 {offsets = [2, 0], sizes = [1, 128], strides = [1, 1]} : vector<3x128xf32> to vector<1x128xf32>
      %50 = vector.broadcast %49 : vector<1x128xf32> to vector<8x128xf32>
      %51 = arith.addf %48, %50 : vector<8x128xf32>
      %c0_26 = arith.constant 0 : index
      %c0_27 = arith.constant 0 : index
      %52 = vector.load %arg7[%c0_26, %c0_27] : memref<8x128xf32, #tpu.memory_space<vmem>>, vector<8x128xf32>
      tpu.vector_store %arg7[%c0_26, %c0_27], %51 {strides = array<i32>} : memref<8x128xf32, #tpu.memory_space<vmem>>, vector<8x128xf32>,
    } else {
    }
    return
  }
  func.func @transform_0(%arg0: i32, %arg1: i32) -> (i32, i32) {
    %c0_i32 = arith.constant 0 : i32
    %c0_i32_0 = arith.constant 0 : i32
    return %arg0, %c0_i32 : i32, i32
  }
  func.func @transform_1(%arg0: i32, %arg1: i32) -> (i32, i32) {
    %c0_i32 = arith.constant 0 : i32
    %c0_i32_0 = arith.constant 0 : i32
    return %c0_i32, %arg1 : i32, i32
  }
  func.func @transform_2(%arg0: i32, %arg1: i32) -> (i32, i32) {
    %c0_i32 = arith.constant 0 : i32
    %c0_i32_0 = arith.constant 0 : i32
    return %c0_i32, %arg1 : i32, i32
  }
  func.func @transform_3(%arg0: i32, %arg1: i32) -> (i32, i32) {
    %c0_i32 = arith.constant 0 : i32
    %c0_i32_0 = arith.constant 0 : i32
    return %arg1, %c0_i32 : i32, i32
  }
  func.func @transform_4(%arg0: i32, %arg1: i32) -> (i32, i32) {
    %c0_i32 = arith.constant 0 : i32
    %c0_i32_0 = arith.constant 0 : i32
    %c0_i32_1 = arith.constant 0 : i32
    return %c0_i32, %c0_i32_0 : i32, i32
  }
  func.func @transform_5(%arg0: i32, %arg1: i32) -> (i32, i32) {
    %c0_i32 = arith.constant 0 : i32
    %c0_i32_0 = arith.constant 0 : i32
    return %arg0, %c0_i32 : i32, i32
  }
}

</mosaic_0001>

<bundles_post_ra>
// kernel: tpu_custom_call.1
= control target key start
LH: loop header
LB: loop body
LE: loop exit
PB: predicated region body
PF: predicated region fallthrough
CT: control target
= control target key end

     0   :  { %10 = vsyncpa [#allocation4], 0  ;;  %s1417_s0 = inlined_call_operand.hbm [shape: f32[16,128], index: 0, kind: input, shape index: {}]   ;;  %s1418_s1 = inlined_call_operand.hbm [shape: f32[128,128], index: 1, kind: input, shape index: {}]   ;;  %s1419_s2 = inlined_call_operand.vmem [shape: f32[1,128], index: 2, kind: input, shape index: {}]   ;;  %s1420_s3 = inlined_call_operand.hbm [shape: f32[128,128], index: 3, kind: input, shape index: {}]   ;;  %s1421_s4 = inlined_call_operand.vmem [shape: f32[3,128], index: 4, kind: input, shape index: {}]   ;;  %s1422_s5 = inlined_call_operand.hbm [shape: f32[16,128], index: 5, kind: output, shape index: {}]  }
   0x1   :  { %12 = vsyncpa [#allocation4 + $0x1], 0 }
   0x2   :  { %13 = vsyncpa [#allocation7], 0 }
   0x3   :  { %14 = vsyncpa [#allocation5], 0 }
   0x4   :  { %16 = vsyncpa [#allocation5 + $0x1], 0  ;;  %s1138_s18 = smov 0   ;;  %s1140_s19 = smov 0  }
   0x5   :  { %s1142_s20 = smov 0   ;;  %s1144_s21 = smov 0  }
   0x6   :  { %s1146_s22 = smov 0   ;;  %s1148_s23 = smov 0  }
   0x7 LB: > { %s664_s24 = sadd.s32 4294967295, %s1097_s23   ;;  %s665_s25 = sadd.s32 4294967294, %s1097_s23   ;;  %s1097_s23 = sphi %s1148_s23, %s22_s23   ;;  %s1093_s22 = sphi %s1146_s22, %s1444_s22   ;;  %s1089_s21 = sphi %s1144_s21, %s1443_s21   ;;  %s1085_s20 = sphi %s1142_s20, %s1442_s20   ;;  %s1081_s19 = sphi %s1140_s19, %s1441_s19   ;;  %s1077_s18 = sphi %s1138_s18, %s1440_s18  }
   0x8   : > { %p54_p0 = scmp.ne.s32.totalorder %s1081_s19, %s1077_s18  ;;  %p1172_p1 = scmp.eq.s32.totalorder %s664_s24, 0 }
   0x9   : > { %p1176_p2 = scmp.eq.s32.totalorder %s664_s24, 1  ;;  %p183_p3 = scmp.eq.s32.totalorder %s665_s25, 1 }
   0xa   : > { %s1427_s26 = scalar_select %p1172_p1, 1, 0 }
   0xb   : > { %p1182_p4 = por %p1172_p1, %p54_p0  ;;  %p666_p5 = scmp.ge.s32.totalorder %s1097_s23, 1 }
   0xc   : > { %p1187_p6 = por %p183_p3, %p54_p0  ;;  %p190_p7 = scmp.lt.s32.totalorder %s1097_s23, 3 }
   0xd   : > { %s1429_s28 = scalar_select %p1182_p4, 1, 0 }
   0xe   : > { %s1430_s29 = scalar_select %p1187_p6, 1, 0 }
   0xf   : > { %p1192_p8 = pnand %p666_p5, %p190_p7  ;;  %s1099_s6 = smov [#allocation6]  }
  0x10   : > { %s204_s7 = sshll.u32 %s1099_s6, 4  ;;  %s1100_s9 = smov [#allocation8]   ;;  %s1196_s7 = int_to_ptr.vmem [resolvable:$true] %s204_s7 }
  0x11   : > { %p847_p9 = pneg %p1192_p8  ;;  %s226_s10 = sshll.u32 %s1100_s9, 4  ;;  %s1207_s10 = int_to_ptr.vmem [resolvable:$true] %s226_s10 }
  0x12   : > { %s925_s13 = scalar_lea.hbm %s1418_s1, 2048 }
  0x13   : > { %p1203_p11 = pnand %p847_p9, %p1172_p1  ;;  %p926_p12 = scmp.ne.s32.totalorder %s1418_s1, %s925_s13 }
  0x14   : > { %p932_p5 = scmp.lt.u32.totalorder %s925_s13, %s1418_s1 }
  0x15   : > { %p927_p13 = pneg %p1203_p11 }
  0x17   : > { %p928_p0 = pnand %p927_p13, %p926_p12 }
  0x19   : > { %p929_p3 = pneg %p928_p0 }
  0x1b   : > { %p934_p7 = pnand %p932_p5, %p929_p3 }
  0x1d   : > { %937 = shalt.err (!%p934_p7)
}
  0x1e   : > { %s938_s24 = scalar_lea.vmem %s1196_s7, 2048  ;;  %p946_p1 = scmp.lt.s32.totalorder %s1196_s7, %s1196_s7 }
  0x1f   : > { %p939_p9 = scmp.ne.s32.totalorder %s1196_s7, %s938_s24  ;;  %p947_p12 = scmp.lt.s32.totalorder %s938_s24, %s938_s24 }
  0x21   : > { %p941_p10 = pnand %p939_p9, %p927_p13  ;;  %p948_p0 = por %p947_p12, %p946_p1 }
  0x23   : > { %p942_p6 = pneg %p941_p10 }
  0x25   : > { %p949_p4 = pnand %p948_p0, %p942_p6 }
  0x27   : > { %952 = shalt.err (!%p949_p4)
}
  0x28   : > { %s1101_s25 = smov 128   ;;  %s1102_s6 = smov 8  }
  0x29   : > { %850 = dma.hbm_to_vmem [thread:$0]  (!%p1203_p11), %s1418_s1, 2048, %s1196_s7, [#allocation7], %s1101_s25, %s1101_s25, %s1102_s6  }
  0x2a   : > { %s953_s14 = scalar_lea.hbm %s1420_s3, 2048 }
  0x2b   : > { %p954_p1 = scmp.ne.s32.totalorder %s1420_s3, %s953_s14  ;;  %p960_p10 = scmp.lt.u32.totalorder %s953_s14, %s1420_s3 }
  0x2d   : > { %p956_p4 = pnand %p954_p1, %p927_p13 }
  0x2f   : > { %p957_p6 = pneg %p956_p4 }
  0x31   : > { %p962_p3 = pnand %p960_p10, %p957_p6 }
  0x33   : > { %965 = shalt.err (!%p962_p3)
}
  0x34   : > { %s966_s7 = scalar_lea.vmem %s1207_s10, 2048  ;;  %p974_p12 = scmp.lt.s32.totalorder %s1207_s10, %s1207_s10 }
  0x35   : > { %p967_p5 = scmp.ne.s32.totalorder %s1207_s10, %s966_s7  ;;  %p975_p0 = scmp.lt.s32.totalorder %s966_s7, %s966_s7 }
  0x37   : > { %p969_p7 = pnand %p967_p5, %p927_p13  ;;  %p976_p1 = por %p975_p0, %p974_p12 }
  0x39   : > { %p970_p9 = pneg %p969_p7 }
  0x3b   : > { %p977_p4 = pnand %p976_p1, %p970_p9 }
  0x3d   : > { %980 = shalt.err (!%p977_p4)
}
  0x3e   : > { %853 = dma.hbm_to_vmem [thread:$0]  (!%p1203_p11), %s1420_s3, 2048, %s1207_s10, [#allocation7], %s1101_s25, %s1101_s25, %s1102_s6  }
  0x3f   : > { %s34_s12 = sadd.s32 1, %s1093_s22  ;;  %s41_s13 = sadd.s32 1, %s1085_s20 }
  0x40   : > { %p36_p13 = scmp.ge.s32.totalorder %s34_s12, 2  ;;  %p48_p6 = scmp.ne.s32.totalorder %s1085_s20, %s1081_s19 }
  0x41   : > { %p49_p10 = scmp.eq.s32.totalorder %s1097_s23, 0  ;;  %p864_p3 = scmp.lt.s32.totalorder %s1097_s23, 2 }
  0x42   : > { %s1446_s12 = smov (%p36_p13, %s34_s12), 0  ;;  %p1271_p7 = por %p1176_p2, %p48_p6 }
  0x43   : > { %p50_p5 = por %p49_p10, %p48_p6  ;;  %s38_s14 = ssub.s32 %s1093_s22, %s1446_s12 }
  0x44   : > { %s1433_s8 = scalar_select %p1271_p7, 1, 0 }
  0x45   : > { %s243_s15 = sand.u32 1, %s1085_s20   ;;  %p39_p9 = scmp.eq.s32.totalorder %s38_s14, 0 }
  0x46   : > { %s671_s10 = sshll.u32 %s243_s15, 3  ;;  %s672_s25 = sshll.u32 %s1093_s22, 7 }
  0x47   : > { %s1280_s6 = scalar_select %p39_p9, %s1085_s20, %s41_s13  }
  0x48   : > { %s1285_s24 = scalar_lea.hbm %s1417_s0, %s672_s25  ;;  %s247_s27 = scalar_lea.vmem [#allocation3], %s671_s10 }
  0x49   : > { %s254_s7 = sshll.u32 %s247_s27, 4  ;;  %p1289_p2 = pnand %p864_p3, %p50_p5  ;;  %s1293_s7 = int_to_ptr.vmem [resolvable:$true] %s254_s7 }
  0x4a   : > { %s244_s11 = scalar_lea.sflag [#allocation4], %s243_s15  ;;  %s981_s13 = scalar_lea.hbm %s1285_s24, 128 }
  0x4b   : > { %p982_p11 = scmp.ne.s32.totalorder %s1285_s24, %s981_s13  ;;  %p983_p12 = pneg %p1289_p2 }
  0x4c   : > { %s986_s25 = scalar_lea.hbm %s1417_s0, 256  ;;  %p987_p4 = scmp.lt.u32.totalorder %s1285_s24, %s1417_s0 }
  0x4d   : > { %p984_p0 = pnand %p983_p12, %p982_p11  ;;  %p988_p13 = scmp.lt.u32.totalorder %s986_s25, %s981_s13 }
  0x4e   : > { %p990_p10 = scmp.lt.u32.totalorder %s981_s13, %s1285_s24 }
  0x4f   : > { %p985_p1 = pneg %p984_p0  ;;  %p989_p6 = por %p988_p13, %p987_p4 }
  0x51   : > { %p991_p3 = por %p990_p10, %p989_p6 }
  0x53   : > { %p992_p5 = pnand %p991_p3, %p985_p1 }
  0x55   : > { %995 = shalt.err (!%p992_p5)
}
  0x56   : > { %s996_s15 = scalar_lea.vmem %s1293_s7, 128  ;;  %s1103_s27 = smov [#allocation3]  }
  0x57   : > { %p997_p9 = scmp.ne.s32.totalorder %s1293_s7, %s996_s15  ;;  %s1001_s14 = sshll.u32 %s1103_s27, 4  ;;  %s1002_s14 = int_to_ptr.vmem [resolvable:$false] %s1001_s14 }
  0x58   : > { %s1003_s10 = scalar_lea.vmem %s1002_s14, 256  ;;  %p1004_p7 = scmp.lt.s32.totalorder %s1293_s7, %s1002_s14 }
  0x59   : > { %p999_p11 = pnand %p997_p9, %p983_p12  ;;  %p1005_p4 = scmp.lt.s32.totalorder %s1003_s10, %s996_s15 }
  0x5b   : > { %p1000_p0 = pneg %p999_p11  ;;  %p1006_p13 = por %p1005_p4, %p1004_p7 }
  0x5d   : > { %p1007_p6 = pnand %p1006_p13, %p1000_p0 }
  0x5f   : > { %1010 = shalt.err (!%p1007_p6)
}
  0x60   : > { %857 = dma.hbm_to_vmem [thread:$0]  (!%p1289_p2), %s1285_s24, 128, %s1293_s7, %s244_s11  }
  0x61   : > { %263 = sbr.rel (%p1192_p8) target bundleno = 901 (0x385), region = 40  ;;  %s1323_s13 = sand.u32 (!%p1192_p8), 1, %s1081_s19  }
  0x62   : > { %s674_s25 = sshll.u32 (!%p1192_p8), %s1323_s13, 3  ;;  %s266_s16 = scalar_lea.sflag (!%p1192_p8), [#allocation4], %s1323_s13 }
  0x63   : > { %s1329_s17 = scalar_lea.vmem (!%p1192_p8), [#allocation3], %s674_s25  ;;  %p1435_p7 = scmp.ne.s32.totalorder (!%p1192_p8), %s1429_s28, 0 }
  0x68   : > { %1064 = dma.done.wait (%p1435_p7), %s266_s16, 128  }
  0x69   : > { %1066 = vsyncadd (%p1435_p7), %s266_s16, 4294967168  ;;  %p1436_p2 = scmp.ne.s32.totalorder %s1427_s26, 0 }
  0x6b   : > { %1068 = dma.done.wait (%p1436_p2), [#allocation7], 4096  }
  0x6c   : > { %1070 = vsyncadd (%p1436_p2), [#allocation7], 4294963200  ;;  %v1104_v0 = vmov 0.0|0.0   ;;  %vm1105_vm0 = vmmov 0   ;;  %v1106_v1 = vmov 0.0   ;;  %v317_v2 = vld [vmem:[#allocation6] sm:$0xff]  ;;  %v505_v56 = vlaneseq }
  0x6d   : > { %787 = vmatprep.subr.bf16.mxu0 %v1104_v0  ;;  %749 = vmatprep.mubr.msk.f32.mxu0 %vm1105_vm0, %v1106_v1  ;;  %v318_v3 = vld [vmem:[#allocation6 + $0x8] sm:$0xff]  ;;  %v319_v4 = vld [vmem:[#allocation6 + $0x10] sm:$0xff]  ;;  %v320_v6 = vld [vmem:[#allocation6 + $0x18] sm:$0xff]  ;;  %s680_s7 = sshll.u32 %s1089_s21, 7  ;;  %s306_s9 = scalar_lea.vmem [#allocation9], %s674_s25 }
  0x6e   : > { %811 = vmatprep.subr.bf16.mxu1 %v1104_v0  ;;  %784 = vmatprep.mubr.msk.f32.mxu1 %vm1105_vm0, %v1106_v1  ;;  %v788_v5 = vpack.c.bf16 %v318_v3, %v317_v2  ;;  %v791_v7 = vpack.c.bf16 %v320_v6, %v319_v4  ;;  %v321_v8 = vld [vmem:[#allocation6 + $0x20] sm:$0xff]  ;;  %v322_v9 = vld [vmem:[#allocation6 + $0x28] sm:$0xff]  ;;  %v414_v12 = vld [vmem:[#allocation8 + $0x10] sm:$0xff]  ;;  %v506_v57 = vshrl.u32 %v505_v56, 7  ;;  %s551_s11 = sshll.u32 %s306_s9, 4  ;;  %s1368_s14 = scalar_lea.hbm %s1422_s5, %s680_s7  ;;  %s1370_s11 = int_to_ptr.vmem [resolvable:$true] %s551_s11 }
  0x6f   : > { %v412_v10 = vld [vmem:[#allocation8] sm:$0xff]  ;;  %v413_v11 = vld [vmem:[#allocation8 + $0x8] sm:$0xff]  ;;  %v415_v13 = vld [vmem:[#allocation8 + $0x18] sm:$0xff]  ;;  %v794_v14 = vpack.c.bf16 %v322_v9, %v321_v8  ;;  %s538_s10 = scalar_lea.sflag [#allocation5], %s1323_s13  ;;  %s1011_s16 = scalar_lea.vmem %s1370_s11, 128 }
  0x70   : > { %789 = vmatpush3.bf16.msra.mxu0 %v788_v5  ;;  %v812_v15 = vpack.c.bf16 %v413_v11, %v412_v10  ;;  %v323_v16 = vld [vmem:[#allocation6 + $0x30] sm:$0xff]  ;;  %v324_v17 = vld [vmem:[#allocation6 + $0x38] sm:$0xff]  ;;  %v815_v18 = vpack.c.bf16 %v415_v13, %v414_v12  ;;  %v416_v19 = vld [vmem:[#allocation8 + $0x20] sm:$0xff]  ;;  %v528_v58 = vsub.s32 1, %v506_v57  ;;  %v533_v59 = vsub.s32 2, %v506_v57  ;;  %p1012_p8 = scmp.ne.s32.totalorder %s1370_s11, %s1011_s16  ;;  %p1437_p12 = scmp.ne.s32.totalorder %s1433_s8, 0 }
  0x71   : > { %790 = vmatprep.subr.bf16.mxu0 %v1104_v0  ;;  %v417_v20 = vld [vmem:[#allocation8 + $0x28] sm:$0xff]  ;;  %v797_v21 = vpack.c.bf16 %v324_v17, %v323_v16  ;;  %v325_v22 = vld [vmem:[#allocation6 + $0x40] sm:$0xff]  ;;  %v418_v25 = vld [vmem:[#allocation8 + $0x30] sm:$0xff]  ;;  %v507_v63 = vsub.s32 0, %v506_v57  ;;  %v516_v5 = vand.u32 127, %v505_v56  ;;  %s1107_s21 = smov [#allocation9]  }
  0x72   : > { %813 = vmatpush3.bf16.msra.mxu1 %v812_v15  ;;  %v326_v23 = vld [vmem:[#allocation6 + $0x48] sm:$0xff]  ;;  %v818_v24 = vpack.c.bf16 %v417_v20, %v416_v19  ;;  %v419_v26 = vld [vmem:[#allocation8 + $0x38] sm:$0xff]  ;;  %v327_v28 = vld [vmem:[#allocation6 + $0x50] sm:$0xff]  ;;  %p1013_p1 = pnand %p1012_p8, %p1437_p12  ;;  %s1015_s25 = sshll.u32 %s1107_s21, 4  ;;  %s1016_s25 = int_to_ptr.vmem [resolvable:$false] %s1015_s25 }
  0x73   : > { %814 = vmatprep.subr.bf16.mxu1 %v1104_v0  ;;  %v800_v27 = vpack.c.bf16 %v326_v23, %v325_v22  ;;  %v328_v29 = vld [vmem:[#allocation6 + $0x58] sm:$0xff]  ;;  %v821_v30 = vpack.c.bf16 %v419_v26, %v418_v25  ;;  %v420_v31 = vld [vmem:[#allocation8 + $0x40] sm:$0xff]  ;;  %v421_v32 = vld [vmem:[#allocation8 + $0x48] sm:$0xff]  ;;  %vm517_vm1 = vcmp.lt.s32.totalorder %v516_v5, 32  ;;  %p1018_p3 = scmp.lt.s32.totalorder %s1370_s11, %s1016_s25 }
  0x74   : > { %792 = vmatpush3.bf16.msra.mxu0 %v791_v7  ;;  %v803_v33 = vpack.c.bf16 %v328_v29, %v327_v28  ;;  %v329_v34 = vld [vmem:[#allocation6 + $0x60] sm:$0xff]  ;;  %v330_v35 = vld [vmem:[#allocation6 + $0x68] sm:$0xff]  ;;  %v824_v36 = vpack.c.bf16 %v421_v32, %v420_v31  ;;  %v422_v37 = vld [vmem:[#allocation8 + $0x50] sm:$0xff]  ;;  %p1014_p10 = pneg %p1013_p1 }
  0x75   : > { %793 = vmatprep.subr.bf16.mxu0 %v1104_v0  ;;  %v423_v38 = vld [vmem:[#allocation8 + $0x58] sm:$0xff]  ;;  %v806_v39 = vpack.c.bf16 %v330_v35, %v329_v34  ;;  %v331_v40 = vld [vmem:[#allocation6 + $0x70] sm:$0xff]  ;;  %v424_v43 = vld [vmem:[#allocation8 + $0x60] sm:$0xff] }
  0x76   : > { %816 = vmatpush3.bf16.msra.mxu1 %v815_v18  ;;  %v332_v41 = vld [vmem:[#allocation6 + $0x78] sm:$0xff]  ;;  %v827_v42 = vpack.c.bf16 %v423_v38, %v422_v37  ;;  %v425_v44 = vld [vmem:[#allocation8 + $0x68] sm:$0xff]  ;;  %v426_v48 = vld [vmem:[#allocation8 + $0x70] sm:$0xff] }
  0x77   : > { %817 = vmatprep.subr.bf16.mxu1 %v1104_v0  ;;  %v809_v45 = vpack.c.bf16 %v332_v41, %v331_v40  ;;  %v830_v46 = vpack.c.bf16 %v425_v44, %v424_v43  ;;  %v316_v47 = vld [vmem:[%s1329_s17] sm:$0xff]  ;;  %s1017_s17 = scalar_lea.vmem %s1016_s25, 256 }
  0x78   : > { %795 = vmatpush3.bf16.msra.mxu0 %v794_v14  ;;  %v427_v49 = vld [vmem:[#allocation8 + $0x78] sm:$0xff]  ;;  %v678_v51 = vld [vmem:[%s1419_s2] ss:$0 sm:$0xff]  ;;  %p1019_p5 = scmp.lt.s32.totalorder %s1017_s17, %s1011_s16 }
  0x79   : > { %796 = vmatprep.subr.bf16.mxu0 %v1104_v0  ;;  %v833_v50 = vpack.c.bf16 %v427_v49, %v426_v48  ;;  %v503_v60 = vld [vmem:[%s1421_s4] sm:$0x7] }
  0x7a   : > { %819 = vmatpush3.bf16.msra.mxu1 %v818_v24  ;;  %v529_v61 = vrot.slane %v503_v60, %v528_v58  ;;  %v534_v62 = vrot.slane %v503_v60, %v533_v59  ;;  %p1020_p9 = por %p1019_p5, %p1018_p3 }
  0x7b   : > { %820 = vmatprep.subr.bf16.mxu1 %v1104_v0 }
  0x7c   : > { %798 = vmatpush3.bf16.msra.mxu0 %v797_v21  ;;  %p1021_p11 = pnand %p1020_p9, %p1014_p10 }
  0x7d   : > { %799 = vmatprep.subr.bf16.mxu0 %v1104_v0 }
  0x7e   : > { %822 = vmatpush3.bf16.msra.mxu1 %v821_v30 }
  0x7f   : > { %823 = vmatprep.subr.bf16.mxu1 %v1104_v0 }
  0x80   : > { %801 = vmatpush3.bf16.msra.mxu0 %v800_v27 }
  0x81   : > { %802 = vmatprep.subr.bf16.mxu0 %v1104_v0 }
  0x82   : > { %825 = vmatpush3.bf16.msra.mxu1 %v824_v36 }
  0x83   : > { %826 = vmatprep.subr.bf16.mxu1 %v1104_v0 }
  0x84   : > { %804 = vmatpush3.bf16.msra.mxu0 %v803_v33 }
  0x85   : > { %805 = vmatprep.subr.bf16.mxu0 %v1104_v0 }
  0x86   : > { %828 = vmatpush3.bf16.msra.mxu1 %v827_v42 }
  0x87   : > { %829 = vmatprep.subr.bf16.mxu1 %v1104_v0 }
  0x88   : > { %807 = vmatpush3.bf16.msra.mxu0 %v806_v39 }
  0x89   : > { %808 = vmatprep.subr.bf16.mxu0 %v1104_v0 }
  0x8a   : > { %831 = vmatpush3.bf16.msra.mxu1 %v830_v46 }
  0x8b   : > { %832 = vmatprep.subr.bf16.mxu1 %v1104_v0  ;;  %v508_v0 = vrot.slane %v503_v60, %v507_v63 }
  0x8c   : > { %810 = vmatpush3.bf16.msra.mxu0 %v809_v45 }
  0x8e   : > { %834 = vmatpush3.bf16.msra.mxu1 %v833_v50 }
  0x8f   : > { %750 = vmatmul.mubr.f32.vlgmr.msra.gmra.mrb[0].mxu0 %v316_v47 }
 0x162   : > { %v406_v52 = vpop.f32.mrb[0].mxu0 }
 0x163   : > { %v407_v53 = vadd.f32 %v678_v51, %v406_v52  ;;  %v751_v54 = vpop.f32.mrb[1].mxu0 }
 0x165   : > { %v410_v55 = vmax.f32 %v407_v53, 0.0 }
 0x167   : > { %785 = vmatmul.mubr.f32.vlgmr.msra.gmra.mrb[0].mxu1 %v410_v55 }
 0x23a   : > { %v494_v1 = vpop.f32.mrb[0].mxu1 }
 0x23b   : > { %v509_v2 = vadd.f32 %v508_v0, %v494_v1  ;;  %v786_v3 = vpop.f32.mrb[1].mxu1 }
 0x23d   : > { %v510_v4 = vadd.f32 %v509_v2, %v316_v47 }
 0x23f   : > { %511 = vadd.xlane.f32.xlu0 %v510_v4 }
 0x2cc   : > { %v512_v6 = vpop.xlane.xlu0 %511 }
 0x2cd   : > { %v513_v7 = vmul.f32 0.03125, %v512_v6 }
 0x2cf   : > { %v514_v8 = vsub.f32 %v510_v4, %v513_v7 }
 0x2d1   : > { %v518_v9 = vsel %vm517_vm1, %v514_v8, 0.0 }
 0x2d2   : > { %v519_v10 = vmul.f32 %v518_v9, %v518_v9 }
 0x2d4   : > { %520 = vadd.xlane.f32.xlu0 %v519_v10 }
 0x361   : > { %v521_v11 = vpop.xlane.xlu0 %520 }
 0x362   : > { %v522_v12 = vmul.f32 0.03125, %v521_v11 }
 0x364   : > { %v523_v13 = vadd.f32 1e-05, %v522_v12 }
 0x366   : > { %923 = vrsqrt.f32 %v523_v13 }
 0x370   : > { %v924_v14 = vpop.eup %923 }
 0x371   : > { %v525_v15 = vmul.f32 %v924_v14, %v518_v9 }
 0x373   : > { %v530_v16 = vmul.f32 %v529_v61, %v525_v15 }
 0x375   : > { %v535_v17 = vadd.f32 %v534_v62, %v530_v16 }
 0x377   : > { %536 = vst [vmem:[%s306_s9] sm:$0xff] %v535_v17 }
 0x378   : > { %1024 = shalt.err (!%p1021_p11)
}
 0x379   : > { %s1025_s13 = scalar_lea.hbm %s1368_s14, 128  ;;  %s1029_s30 = scalar_lea.hbm %s1422_s5, 256 }
 0x37a   : > { %p1026_p0 = scmp.ne.s32.totalorder %s1368_s14, %s1025_s13  ;;  %p1030_p6 = scmp.lt.u32.totalorder %s1368_s14, %s1422_s5 }
 0x37b   : > { %p1031_p7 = scmp.lt.u32.totalorder %s1029_s30, %s1025_s13  ;;  %p1033_p8 = scmp.lt.u32.totalorder %s1025_s13, %s1368_s14 }
 0x37c   : > { %p1027_p4 = pnand %p1026_p0, %p1437_p12 }
 0x37d   : > { %p1032_p2 = por %p1031_p7, %p1030_p6 }
 0x37e   : > { %p1028_p13 = pneg %p1027_p4 }
 0x37f   : > { %p1034_p1 = por %p1033_p8, %p1032_p2 }
 0x381   : > { %p1035_p10 = pnand %p1034_p1, %p1028_p13 }
 0x383   : > { %1038 = shalt.err (!%p1035_p10)
}
 0x384   : > { %845 = dma.vmem_to_hbm [thread:$0]  (%p1437_p12), %s1370_s11, 128, %s1368_s14, %s538_s10  }
 0x385 PF: > { %s563_s9 = sand.u32 1, %s1077_s18   ;;  %p1438_p3 = scmp.ne.s32.totalorder %s1430_s29, 0 }
 0x386   : > { %p1439_p5 = scmp.ge.s32.totalorder %s1097_s23, 2  ;;  %s564_s15 = scalar_lea.sflag [#allocation5], %s563_s9 }
 0x388   : > { %p859_p9 = pnand %p1439_p5, %p1438_p3 }
 0x38a   : > { %1072 = dma.done.wait (!%p859_p9), %s564_s15, 128  }
 0x38b   : > { %1074 = vsyncadd (!%p859_p9), %s564_s15, 4294967168  ;;  %s22_s23 = sadd.s32 1, %s1097_s23   ;;  %s1440_s18 = smov %s1081_s19 }
 0x38c   : > { %p19_p11 = scmp.ge.s32.totalorder %s22_s23, 4   ;;  %s1441_s19 = smov %s1085_s20 }
 0x38d   : > { %s1442_s20 = smov %s1280_s6  ;;  %s1443_s21 = smov %s1093_s22 }
 0x38e   : > { %s1444_s22 = smov %s1446_s12  ;;  %21 = sbr.rel (!%p19_p11) target bundleno = 7 (0x7), region = 106 }
 0x395   :  { %569 = vsyncpa [#allocation4], 1 }
 0x396   :  { %571 = vsyncpa [#allocation4 + $0x1], 1 }
 0x397   :  { %572 = vsyncpa [#allocation7], 1 }
 0x398   :  { %573 = vsyncpa [#allocation5], 1 }
 0x399   :  { %575 = vsyncpa [#allocation5 + $0x1], 1 }

</bundles_post_ra>
